<compile_context>
chip_gen: v6e
topology: v6e:2x2x1
jax: 0.10.0
libtpu: 0.0.40
codegen_flags: <defaults>
</compile_context>

<pallas_src>
import jax
import jax.numpy as jnp
from jax.experimental import pallas as pl
from jax.experimental.pallas import tpu as pltpu


# ---------------------------------------------------------------------------
# Kernels
# ---------------------------------------------------------------------------
def _reduce_kernel(x_ref, mean_ref, m2_ref):
    """Per-row running mean / centered M2 (row = one (batch, channel) pair).

    Chan-style parallel combine across spatial tiles: each tile contributes its
    own mean and centered sum-of-squares, avoiding the catastrophic
    cancellation of the naive sum / sum-of-squares formula.

    x_ref:    (TR, THW) block in native dtype (lane axis = spatial).
    mean_ref: (TR, 1) f32 running mean, resident across the spatial grid axis.
    m2_ref:   (TR, 1) f32 running centered sum of squares.
    """
    j = pl.program_id(1)
    xb = x_ref[...].astype(jnp.float32)
    nb = jnp.float32(xb.shape[1])
    tile_mean = jnp.sum(xb, axis=1, keepdims=True) / nb
    ctr = xb - tile_mean
    tile_m2 = jnp.sum(ctr * ctr, axis=1, keepdims=True)

    @pl.when(j == 0)
    def _():
        mean_ref[...] = tile_mean
        m2_ref[...] = tile_m2

    @pl.when(j > 0)
    def _():
        na = j * nb                       # elements folded in so far (f32)
        tot = na + nb
        delta = tile_mean - mean_ref[...]
        mean_ref[...] = mean_ref[...] + delta * (nb / tot)
        m2_ref[...] = m2_ref[...] + tile_m2 + delta * delta * (na * nb / tot)


def _affine_kernel(x_ref, es_ref, t_ref, o_ref):
    """z = x * exp(s) + t, per-row scale/shift broadcast along lanes."""
    o_ref[...] = (x_ref[...].astype(jnp.float32) * es_ref[...]
                  + t_ref[...]).astype(o_ref.dtype)


def _fused_init_kernel(x_ref, z_ref, s_ref):
    """Single-pass data-dependent init + affine when the tensor fits in VMEM.

    Reads x from HBM exactly once; uses a centered (two-pass-in-VMEM) variance
    and writes z = exp(s) * (x - mean), which is algebraically x*exp(s) + t
    but needs one fewer full-size f32 temporary.
    """
    x = x_ref[...].astype(jnp.float32)                        # (B, C, HW)
    n = jnp.float32(x.shape[0] * x.shape[2])
    sums = jnp.sum(jnp.sum(x, axis=2, keepdims=True), axis=0, keepdims=True)
    mean = sums / n                                           # (1, C, 1)
    ctr = x - mean                                            # x dead after this
    var = jnp.sum(jnp.sum(ctr * ctr, axis=2, keepdims=True),
                  axis=0, keepdims=True) / jnp.maximum(n - 1.0, 1.0)
    std = jnp.sqrt(jnp.maximum(var, 0.0))
    s = -jnp.log(std)
    s = jnp.where(jnp.isinf(s) | jnp.isnan(s), jnp.float32(0.0), s)
    z_ref[...] = (ctr * jnp.exp(s)).astype(z_ref.dtype)       # == x*exp(s) + t
    s_ref[...] = s                                            # (1, C, 1)


# ---------------------------------------------------------------------------
# Tiling helpers
# ---------------------------------------------------------------------------
def _pick_tiles(rows, hw, itemsize, max_bytes=2 << 20):
    """Pick (row_tile, lane_tile) for the 2-D (rows, hw) view.

    Lane tile: largest multiple of 128 dividing hw such that an 8-row block is
    under budget; when hw is not 128-aligned we keep the full extent (always a
    legal block shape) and tile only rows, so no giant full-tensor block.
    Row tile: multiple of 8 (or full extent when rows < 8), grown while it
    divides rows and the block stays under budget.  Non-multiple row counts use
    a cdiv grid with a padded tail block (reads are don't-care, writes clipped).
    """
    thw = hw
    if hw % 128 == 0:
        while thw % 256 == 0 and 8 * thw * itemsize > max_bytes:
            thw //= 2
    # TODO(synk): if hw is both non-128-aligned and so large that a single
    # (8, hw) block exceeds VMEM, a masked ragged-lane tiling would be needed.
    if rows < 8:
        tr = rows
    else:
        tr = 8
        while rows % (tr * 2) == 0 and (tr * 2) * thw * itemsize <= max_bytes:
            tr *= 2
    return tr, thw


# ---------------------------------------------------------------------------
# Wrapper
# ---------------------------------------------------------------------------
def actnorm2d_forward(x, s=None, t=None, logdetj=False,
                      fused_vmem_budget=40 << 20, tile_bytes=2 << 20,
                      force_two_pass=False):
    """ActNorm2D.forward on NCHW input.

    s, t None -> data-dependent init (first-call behavior); otherwise the given
    (1, C) parameters are used directly ('data_dep_init_done' path).
    Output z has the same dtype as x; log_det is f32 of shape (B*H*W,).
    """
    B, C, H, W = x.shape
    HW = H * W
    N = B * HW
    rows = B * C
    dt = x.dtype
    itemsize = jnp.dtype(dt).itemsize
    need_init = (s is None) or (t is None)

    # ---------------- fused single-pass init path (fits in VMEM) ------------
    # True in-kernel footprint: ~double-buffered native in/out blocks plus two
    # full-size f32 temporaries (upcast x, centered x).
    fused_est = B * C * HW * (4 * itemsize + 8)
    if need_init and not force_two_pass and fused_est <= fused_vmem_budget:
        xv3 = x.reshape(B, C, HW)       # free reshape: NCHW stays contiguous
        z_v, s_col = pl.pallas_call(
            _fused_init_kernel,
            out_shape=(jax.ShapeDtypeStruct((B, C, HW), dt),
                       jax.ShapeDtypeStruct((1, C, 1), jnp.float32)),
            grid_spec=pltpu.PrefetchScalarGridSpec(
                num_scalar_prefetch=0,
                grid=(1,),
                in_specs=[pl.BlockSpec((B, C, HW), lambda i: (0, 0, 0))],
                out_specs=(pl.BlockSpec((B, C, HW), lambda i: (0, 0, 0)),
                           pl.BlockSpec((1, C, 1), lambda i: (0, 0, 0)))),
            compiler_params=pltpu.CompilerParams(vmem_limit_bytes=48 << 20),
        )(xv3)
        z = z_v.reshape(B, C, H, W)
        if logdetj:
            return z, jnp.broadcast_to(jnp.sum(s_col), (N,))
        return z

    # ---------------- tiled path on the 2-D (B*C, HW) view ------------------
    xv = x.reshape(rows, HW)            # free reshape: NCHW stays contiguous
    tr, thw = _pick_tiles(rows, HW, itemsize, tile_bytes)
    n_r = (rows + tr - 1) // tr
    n_hw = HW // thw
    grid = (n_r, n_hw)

    if need_init:
        mean_rows, m2_rows = pl.pallas_call(
            _reduce_kernel,
            out_shape=(jax.ShapeDtypeStruct((rows, 1), jnp.float32),
                       jax.ShapeDtypeStruct((rows, 1), jnp.float32)),
            grid_spec=pltpu.PrefetchScalarGridSpec(
                num_scalar_prefetch=0,
                grid=grid,
                in_specs=[pl.BlockSpec((tr, thw), lambda r, j: (r, j))],
                out_specs=(pl.BlockSpec((tr, 1), lambda r, j: (r, 0)),
                           pl.BlockSpec((tr, 1), lambda r, j: (r, 0)))),
            compiler_params=pltpu.CompilerParams(
                dimension_semantics=("parallel", "arbitrary"),
                vmem_limit_bytes=32 << 20),
        )(xv)
        # Tiny (B, C) glue: Chan-merge the per-(batch,channel) stats over B.
        mean_bc = mean_rows.reshape(B, C)
        m2_bc = m2_rows.reshape(B, C)
        mean_c = jnp.mean(mean_bc, axis=0)                          # (C,)
        m2_c = (jnp.sum(m2_bc, axis=0)
                + jnp.float32(HW) * jnp.sum((mean_bc - mean_c) ** 2, axis=0))
        var_c = m2_c / jnp.float32(max(N - 1, 1))
        std = jnp.sqrt(jnp.maximum(var_c, 0.0))
        s = -jnp.log(std)
        s = jnp.where(jnp.isinf(s) | jnp.isnan(s), jnp.float32(0.0), s)
        t = -(jnp.exp(s) * mean_c)
        s = s.reshape(1, C)
        t = t.reshape(1, C)

    s = s.astype(jnp.float32).reshape(1, C)
    t = t.astype(jnp.float32).reshape(1, C)
    # Per-row scale/shift columns; exp(s) hoisted out of the hot loop.
    es_rows = jnp.broadcast_to(jnp.exp(s), (B, C)).reshape(rows, 1)
    t_rows = jnp.broadcast_to(t, (B, C)).reshape(rows, 1)

    z_v = pl.pallas_call(
        _affine_kernel,
        out_shape=jax.ShapeDtypeStruct((rows, HW), dt),
        grid_spec=pltpu.PrefetchScalarGridSpec(
            num_scalar_prefetch=0,
            grid=grid,
            in_specs=[pl.BlockSpec((tr, thw), lambda r, j: (r, j)),
                      pl.BlockSpec((tr, 1), lambda r, j: (r, 0)),
                      pl.BlockSpec((tr, 1), lambda r, j: (r, 0))],
            out_specs=pl.BlockSpec((tr, thw), lambda r, j: (r, j))),
        compiler_params=pltpu.CompilerParams(
            dimension_semantics=("parallel", "parallel"),
            vmem_limit_bytes=32 << 20),
    )(xv, es_rows, t_rows)

    z = z_v.reshape(B, C, H, W)
    if logdetj:
        # Kept as a materialized (B*H*W,) array to preserve the module's
        # output shape; callers that accept a scalar can use jnp.sum(s).
        return z, jnp.broadcast_to(jnp.sum(s), (N,))
    return z


# ---------------------------------------------------------------------------
# Pure-JAX reference (mirrors the torch code path exactly)
# ---------------------------------------------------------------------------
def _ref_forward(x):
    xt = jnp.transpose(x, (0, 3, 2, 1))           # torch x.transpose(1, 3)
    xs1 = xt.shape
    xf = xt.reshape(-1, xs1[3])
    std = jnp.std(xf, axis=0, ddof=1, keepdims=True)
    s = -jnp.log(std)
    s = jnp.where(jnp.isinf(s) | jnp.isnan(s), 0.0, s)
    t = -jnp.mean(xf * jnp.exp(s), axis=0, keepdims=True)
    z = xf * jnp.exp(s) + t
    log_det = jnp.broadcast_to(jnp.sum(s), (xf.shape[0],))
    return jnp.transpose(z.reshape(xs1), (0, 3, 2, 1)), log_det


if __name__ == "__main__":
    key = jax.random.PRNGKey(0)
    B, C, H, W = 2, 4, 16, 16
    kx, ks, kt, kx2, kx3 = jax.random.split(key, 5)
    x = jax.random.normal(kx, (B, C, H, W), dtype=jnp.float32) * 2.0 + 0.5

    # Parameters as declared in AffineConstantFlow.__init__ (shape (1, C)).
    s_param = jax.random.normal(ks, (1, C), dtype=jnp.float32)
    t_param = jax.random.normal(kt, (1, C), dtype=jnp.float32)

    z_ref, ld_ref = _ref_forward(x)

    # 1) fused single-pass data-dependent-init path (small tensors).
    z, log_det = actnorm2d_forward(x, logdetj=True)
    z = jax.block_until_ready(z)
    log_det = jax.block_until_ready(log_det)
    assert z.shape == (B, C, H, W) and log_det.shape == (B * H * W,)
    assert z.dtype == x.dtype
    assert jnp.allclose(z, z_ref, rtol=1e-4, atol=1e-4), "z mismatch (fused)"
    assert jnp.allclose(log_det, ld_ref, rtol=1e-4, atol=1e-4), "logdet mismatch (fused)"

    # 2) two-pass (reduce + affine) init path, as used for large tensors.
    z2, log_det2 = actnorm2d_forward(x, logdetj=True, force_two_pass=True)
    z2 = jax.block_until_ready(z2)
    assert jnp.allclose(z2, z_ref, rtol=1e-4, atol=1e-4), "z mismatch (two-pass)"
    assert jnp.allclose(log_det2, ld_ref, rtol=1e-4, atol=1e-4), "logdet mismatch (two-pass)"

    # 3) "data_dep_init_done" path: affine-only with externally supplied s, t.
    z3 = jax.block_until_ready(actnorm2d_forward(x, s=s_param, t=t_param))
    z3_ref = (x.reshape(B, C, -1) * jnp.exp(s_param).reshape(1, C, 1)
              + t_param.reshape(1, C, 1)).reshape(B, C, H, W)
    assert jnp.allclose(z3, z3_ref, rtol=1e-4, atol=1e-4), "z mismatch (affine-only)"

    # 4) non-128-aligned spatial extent (full-lane fallback, row tiling only).
    xb = jax.random.normal(kx2, (2, 4, 10, 10), dtype=jnp.float32) * 3.0 - 1.0
    zb_ref, ldb_ref = _ref_forward(xb)
    zb, ldb = actnorm2d_forward(xb, logdetj=True, force_two_pass=True)
    zb = jax.block_until_ready(zb)
    assert jnp.allclose(zb, zb_ref, rtol=1e-4, atol=1e-4), "z mismatch (unaligned HW)"
    assert jnp.allclose(ldb, ldb_ref, rtol=1e-4, atol=1e-4), "logdet mismatch (unaligned HW)"

    # 5) row count not a multiple of the sublane tile (padded tail row block).
    xc = jax.random.normal(kx3, (3, 3, 16, 16), dtype=jnp.float32) + 4.0
    zc_ref, ldc_ref = _ref_forward(xc)
    zc, ldc = actnorm2d_forward(xc, logdetj=True, force_two_pass=True)
    zc = jax.block_until_ready(zc)
    assert jnp.allclose(zc, zc_ref, rtol=1e-4, atol=1e-4), "z mismatch (ragged rows)"
    assert jnp.allclose(ldc, ldc_ref, rtol=1e-4, atol=1e-4), "logdet mismatch (ragged rows)"

    # TODO(synk): inverse() path of the Flow module (x = (z - t) * exp(-s)) not implemented here.
    print("KERNEL_OK")
</pallas_src>

<mosaic_0001>
module attributes {stable_mosaic.version = 11 : i64} {
  func.func @_fused_init_kernel(%arg0: i32, %arg1: memref<2x4x256xf32, #tpu.memory_space<vmem>>, %arg2: memref<2x4x256xf32, #tpu.memory_space<vmem>>, %arg3: memref<1x4x1xf32, #tpu.memory_space<vmem>>) attributes {dimension_semantics = [#tpu.dimension_semantics<arbitrary>], iteration_bounds = array<i64: 1>, scalar_prefetch = 0 : i64, scratch_operands = 0 : i64, tpu.core_type = #tpu.core_type<tc>, window_params = [{pipeline_mode = #tpu.pipeline_mode<synchronous>, transform_indices = @transform_0, window_bounds = array<i64: 2, 4, 256>}, {pipeline_mode = #tpu.pipeline_mode<synchronous>, transform_indices = @transform_1, window_bounds = array<i64: 2, 4, 256>}, {pipeline_mode = #tpu.pipeline_mode<synchronous>, transform_indices = @transform_2, window_bounds = array<i64: 1, 4, 1>}]} {
    %c0 = arith.constant 0 : index
    %c0_0 = arith.constant 0 : index
    %c0_1 = arith.constant 0 : index
    %0 = vector.load %arg1[%c0, %c0_0, %c0_1] : memref<2x4x256xf32, #tpu.memory_space<vmem>>, vector<2x4x256xf32>
    %cst = arith.constant dense<0.000000e+00> : vector<2x4xf32>
    %1 = vector.multi_reduction <add>, %0, %cst [2] : vector<2x4x256xf32> to vector<2x4xf32>
    %2 = vector.shape_cast %1 : vector<2x4xf32> to vector<2x4x1xf32>
    %cst_2 = arith.constant dense<0.000000e+00> : vector<4x1xf32>
    %3 = vector.multi_reduction <add>, %2, %cst_2 [0] : vector<2x4x1xf32> to vector<4x1xf32>
    %4 = vector.shape_cast %3 : vector<4x1xf32> to vector<1x4x1xf32>
    %cst_3 = arith.constant 5.120000e+02 : f32
    %5 = vector.broadcast %cst_3 : f32 to vector<1x4x1xf32>
    %6 = arith.divf %4, %5 : vector<1x4x1xf32>
    %7 = vector.broadcast %6 : vector<1x4x1xf32> to vector<2x4x256xf32>
    %8 = arith.subf %0, %7 : vector<2x4x256xf32>
    %9 = arith.mulf %8, %8 : vector<2x4x256xf32>
    %cst_4 = arith.constant dense<0.000000e+00> : vector<2x4xf32>
    %10 = vector.multi_reduction <add>, %9, %cst_4 [2] : vector<2x4x256xf32> to vector<2x4xf32>
    %11 = vector.shape_cast %10 : vector<2x4xf32> to vector<2x4x1xf32>
    %cst_5 = arith.constant dense<0.000000e+00> : vector<4x1xf32>
    %12 = vector.multi_reduction <add>, %11, %cst_5 [0] : vector<2x4x1xf32> to vector<4x1xf32>
    %13 = vector.shape_cast %12 : vector<4x1xf32> to vector<1x4x1xf32>
    %cst_6 = arith.constant 5.120000e+02 : f32
    %cst_7 = arith.constant 1.000000e+00 : f32
    %14 = arith.subf %cst_6, %cst_7 : f32
    %cst_8 = arith.constant 1.000000e+00 : f32
    %15 = arith.maximumf %14, %cst_8 : f32
    %16 = vector.broadcast %15 : f32 to vector<1x4x1xf32>
    %17 = arith.divf %13, %16 : vector<1x4x1xf32>
    %cst_9 = arith.constant 0.000000e+00 : f32
    %18 = vector.broadcast %cst_9 : f32 to vector<1x4x1xf32>
    %19 = arith.maximumf %17, %18 : vector<1x4x1xf32>
    %20 = math.sqrt %19 : vector<1x4x1xf32>
    %21 = math.log %20 : vector<1x4x1xf32>
    %cst_10 = arith.constant 0.000000e+00 : f32
    %22 = vector.broadcast %cst_10 : f32 to vector<1x4x1xf32>
    %23 = arith.subf %22, %21 : vector<1x4x1xf32>
    %24 = math.absf %23 : vector<1x4x1xf32>
    %cst_11 = arith.constant 0x7F800000 : f32
    %25 = vector.broadcast %cst_11 : f32 to vector<1x4x1xf32>
    %26 = arith.cmpf oeq, %24, %25 : vector<1x4x1xf32>
    %27 = arith.cmpf one, %23, %23 : vector<1x4x1xf32>
    %28 = arith.ori %26, %27 : vector<1x4x1xi1>
    %cst_12 = arith.constant 0.000000e+00 : f32
    %29 = vector.broadcast %cst_12 : f32 to vector<1x4x1xf32>
    %30 = arith.select %28, %29, %23 : vector<1x4x1xi1>, vector<1x4x1xf32>
    %31 = math.exp %30 : vector<1x4x1xf32>
    %32 = vector.broadcast %31 : vector<1x4x1xf32> to vector<2x4x256xf32>
    %33 = arith.mulf %8, %32 : vector<2x4x256xf32>
    %c0_13 = arith.constant 0 : index
    %c0_14 = arith.constant 0 : index
    %c0_15 = arith.constant 0 : index
    %34 = vector.load %arg2[%c0_13, %c0_14, %c0_15] : memref<2x4x256xf32, #tpu.memory_space<vmem>>, vector<2x4x256xf32>
    tpu.vector_store %arg2[%c0_13, %c0_14, %c0_15], %33 {strides = array<i32>} : memref<2x4x256xf32, #tpu.memory_space<vmem>>, vector<2x4x256xf32>,
    %c0_16 = arith.constant 0 : index
    %c0_17 = arith.constant 0 : index
    %c0_18 = arith.constant 0 : index
    %35 = vector.load %arg3[%c0_16, %c0_17, %c0_18] : memref<1x4x1xf32, #tpu.memory_space<vmem>>, vector<1x4x1xf32>
    tpu.vector_store %arg3[%c0_16, %c0_17, %c0_18], %30 {strides = array<i32>} : memref<1x4x1xf32, #tpu.memory_space<vmem>>, vector<1x4x1xf32>,
    return
  }
  func.func @transform_0(%arg0: i32) -> (i32, i32, i32) {
    %c0_i32 = arith.constant 0 : i32
    %c0_i32_0 = arith.constant 0 : i32
    %c0_i32_1 = arith.constant 0 : i32
    %c0_i32_2 = arith.constant 0 : i32
    return %c0_i32, %c0_i32_0, %c0_i32_1 : i32, i32, i32
  }
  func.func @transform_1(%arg0: i32) -> (i32, i32, i32) {
    %c0_i32 = arith.constant 0 : i32
    %c0_i32_0 = arith.constant 0 : i32
    %c0_i32_1 = arith.constant 0 : i32
    %c0_i32_2 = arith.constant 0 : i32
    return %c0_i32, %c0_i32_0, %c0_i32_1 : i32, i32, i32
  }
  func.func @transform_2(%arg0: i32) -> (i32, i32, i32) {
    %c0_i32 = arith.constant 0 : i32
    %c0_i32_0 = arith.constant 0 : i32
    %c0_i32_1 = arith.constant 0 : i32
    %c0_i32_2 = arith.constant 0 : i32
    return %c0_i32, %c0_i32_0, %c0_i32_1 : i32, i32, i32
  }
}

</mosaic_0001>

<bundles_post_ra>
// kernel: tpu_custom_call.1
= control target key start
LH: loop header
LB: loop body
LE: loop exit
PB: predicated region body
PF: predicated region fallthrough
CT: control target
= control target key end

     0   :  { %8 = vsyncpa [#allocation3], 0  ;;  %s241_s0 = inlined_call_operand.hbm [shape: f32[2,4,256], index: 0, kind: input, shape index: {}]   ;;  %s242_s1 = inlined_call_operand.hbm [shape: f32[2,4,256], index: 1, kind: output, shape index: {0}]   ;;  %s243_s2 = inlined_call_operand.vmem [shape: f32[1,4,1], index: 2, kind: output, shape index: {1}]  }
   0x1   :  { %9 = vsyncpa [#allocation4], 0  ;;  %s194_s9 = smov [#allocation2]  }
   0x2   :  { %s15_s10 = sshll.u32 %s194_s9, 4  ;;  %s16_s10 = int_to_ptr.vmem [resolvable:$true] %s15_s10 }
   0x3   :  { %s158_s11 = scalar_lea.vmem %s16_s10, 256  ;;  %p163_p1 = scmp.lt.s32.totalorder %s16_s10, %s16_s10 }
   0x4   :  { %p159_p0 = scmp.ne.s32.totalorder %s16_s10, %s158_s11  ;;  %p164_p2 = scmp.lt.s32.totalorder %s158_s11, %s158_s11 }
   0x6   :  { %p165_p3 = por %p164_p2, %p163_p1 }
   0x8   :  { %p166_p4 = pnand %p165_p3, %p159_p0 }
   0xa   :  { %169 = shalt.err (!%p166_p4)
}
   0xb   :  { %s195_s12 = smov 128   ;;  %s196_s13 = smov 8  }
   0xc   :  { %21 = dma.hbm_to_vmem [thread:$0]  %s241_s0, 256, %s16_s10, [#allocation3], %s195_s12, %s195_s12, %s196_s13  }
   0xd   :  { %190 = dma.done.wait [#allocation3], 256  }
   0xe   :  { %191 = vsyncadd [#allocation3], 4294967040  ;;  %vm33_vm0 = vcmask 1043456   ;;  %v25_v0 = vld [vmem:[#allocation2] sm:$0xff]  ;;  %v26_v1 = vld [vmem:[#allocation2 + $0x8] sm:$0xff]  ;;  %v53_v12 = vlaneseq  ;;  %vm114_vm5 = vcmask 3072  }
   0xf   :  { %v29_v2 = vcombine.high %v25_v0, %v25_v0  ;;  %v34_v3 = vsel %vm33_vm0, %v25_v0, 0.0  ;;  %v30_v4 = vcombine.high %v26_v1, %v26_v1  ;;  %v39_v6 = vsel %vm33_vm0, %v26_v1, 0.0  ;;  %s198_s17 = smov [#allocation5]  }
  0x10   :  { %v197_v10 = vmov 839922192   ;;  %v54_v15 = vshrl.u32 %v53_v12, 7  ;;  %s121_s18 = sshll.u32 %s198_s17, 4  ;;  %s122_s18 = int_to_ptr.vmem [resolvable:$true] %s121_s18 }
  0x11   :  { %v35_v5 = vsel %vm33_vm0, %v29_v2, 0.0  ;;  %v40_v7 = vsel %vm33_vm0, %v30_v4, 0.0  ;;  %v51_v11 = vunpack.c.l.s4 %v197_v10  ;;  %s170_s19 = scalar_lea.vmem %s122_s18, 256  ;;  %p175_p6 = scmp.lt.s32.totalorder %s122_s18, %s122_s18 }
  0x12   :  { %v36_v8 = vadd.f32 %v35_v5, %v34_v3  ;;  %v41_v9 = vadd.f32 %v40_v7, %v39_v6  ;;  %p171_p5 = scmp.ne.s32.totalorder %s122_s18, %s170_s19  ;;  %p176_p7 = scmp.lt.s32.totalorder %s170_s19, %s170_s19 }
  0x13   :  { %v52_v14 = vunpack.c.0.s8 %v51_v11 }
  0x14   :  { %37 = vadd.xlane.f32.xlu0 %v36_v8  ;;  %p177_p8 = por %p176_p7, %p175_p6 }
  0x15   :  { %v55_v19 = vsub.s32 %v52_v14, %v54_v15 }
  0x16   :  { %p178_p9 = pnand %p177_p8, %p171_p5 }
  0x18   :  { %42 = vadd.xlane.f32.xlu0 %v41_v9 }
  0x9d   :  { %v38_v13 = vpop.xlane.xlu0 %37 }
  0x9e   :  { %v44_v17 = vsel %vm33_vm0, %v38_v13, 0.0 }
  0xa1   :  { %v43_v16 = vpop.xlane.xlu0 %42 }
  0xa2   :  { %v45_v18 = vsel %vm33_vm0, %v43_v16, 0.0 }
  0xa3   :  { %v46_v20 = vadd.f32 %v45_v18, %v44_v17 }
  0xa5   :  { %v48_v21 = vmul.f32 0.001953125, %v46_v20 }
  0xa7   :  { %v56_v22 = vrot.slane %v48_v21, %v55_v19 }
  0xa9   :  { %v59_v23 = vsub.f32 %v26_v1, %v56_v22  ;;  %v58_v24 = vsub.f32 %v25_v0, %v56_v22 }
  0xab   :  { %v60_v25 = vmul.f32 %v58_v24, %v58_v24  ;;  %v61_v26 = vmul.f32 %v59_v23, %v59_v23 }
  0xad   :  { %v64_v27 = vcombine.high %v60_v25, %v60_v25  ;;  %v65_v28 = vcombine.high %v61_v26, %v61_v26  ;;  %v68_v29 = vsel %vm33_vm0, %v60_v25, 0.0  ;;  %v73_v33 = vsel %vm33_vm0, %v61_v26, 0.0 }
  0xaf   :  { %v69_v30 = vsel %vm33_vm0, %v64_v27, 0.0  ;;  %v74_v32 = vsel %vm33_vm0, %v65_v28, 0.0 }
  0xb0   :  { %v70_v31 = vadd.f32 %v69_v30, %v68_v29  ;;  %v75_v34 = vadd.f32 %v74_v32, %v73_v33 }
  0xb2   :  { %71 = vadd.xlane.f32.xlu1 %v70_v31 }
  0xb6   :  { %76 = vadd.xlane.f32.xlu1 %v75_v34 }
 0x13b   :  { %v72_v35 = vpop.xlane.xlu1 %71 }
 0x13c   :  { %v78_v37 = vsel %vm33_vm0, %v72_v35, 0.0 }
 0x13f   :  { %v77_v36 = vpop.xlane.xlu1 %76 }
 0x140   :  { %v79_v38 = vsel %vm33_vm0, %v77_v36, 0.0 }
 0x141   :  { %v80_v39 = vadd.f32 %v79_v38, %v78_v37 }
 0x143   :  { %v82_v40 = vmul.f32 0.0019569471, %v80_v39 }
 0x145   :  { %v83_v41 = vmax.f32 %v82_v40, 0.0 }
 0x147   :  { %144 = vrsqrt.f32 %v83_v41  ;;  %vm86_vm1 = vcmp.eq.f32.partialorder %v83_v41, inf  ;;  %v89_v44 = vand.u32 2147483648, %v83_v41  ;;  %vm88_vm2 = vcmp.eq.f32.partialorder %v83_v41, 0.0 }
 0x154   :  { %v145_v42 = vpop.eup %144 }
 0x155   :  { %v85_v43 = vmul.f32 %v145_v42, %v83_v41 }
 0x157   :  { %v87_v45 = vsel %vm86_vm1, %v83_v41, %v85_v43 }
 0x158   :  { %v90_v46 = vsel %vm88_vm2, %v89_v44, %v87_v45 }
 0x159   :  { %146 = vlog2.f32 %v90_v46 }
 0x166   :  { %v147_v47 = vpop.eup %146 }
 0x167   :  { %v92_v48 = vmul.f32 0.6931472, %v147_v47 }
 0x169   :  { %v93_v49 = vsub.f32 0.0, %v92_v48 }
 0x16b   :  { %v94_v50 = vand.u32 2147483647, %v93_v49  ;;  %vm96_vm4 = vcmp.ne.f32.partialorder %v93_v49, %v93_v49 }
 0x16d   :  { %vm95_vm3 = vcmp.eq.f32.partialorder %v94_v50, inf }
 0x16e   :  { %vm97_vm6 = vmor %vm95_vm3, %vm96_vm4 }
 0x16f   :  { %v98_v51 = vsel %vm97_vm6, 0.0, %v93_v49 }
 0x170   :  { %v99_v52 = vmul.f32 1.442695, %v98_v51  ;;  %115 = vst.msk [vmem:[%s243_s2] sm:$0xf] %vm114_vm5, %v98_v51 }
 0x172   :  { %148 = vpow2.f32 %v99_v52 }
 0x17f   :  { %v149_v53 = vpop.eup %148 }
 0x180   :  { %v108_v54 = vrot.slane %v149_v53, %v55_v19 }
 0x182   :  { %v110_v55 = vmul.f32 %v108_v54, %v58_v24  ;;  %v111_v56 = vmul.f32 %v108_v54, %v59_v23 }
 0x184   :  { %112 = vst [vmem:[#allocation5] sm:$0xff] %v110_v55  ;;  %113 = vst [vmem:[#allocation5 + $0x8] sm:$0xff] %v111_v56 }
 0x185   :  { %181 = shalt.err (!%p178_p9)
}
 0x186   :  { %127 = dma.vmem_to_hbm [thread:$0]  %s122_s18, 256, %s242_s1, [#allocation4], %s195_s12, %s195_s12, %s196_s13  }
 0x187   :  { %192 = dma.done.wait [#allocation4], 256  }
 0x188   :  { %193 = vsyncadd [#allocation4], 4294967040 }
 0x189   :  { %135 = vsyncpa [#allocation3], 1 }
 0x18a   :  { %136 = vsyncpa [#allocation4], 1 }

</bundles_post_ra>
